<compile_context>
chip_gen: v7x
topology: tpu7x:2x2x1
jax: 0.10.0
libtpu: 0.0.40
codegen_flags: <defaults>
</compile_context>

<pallas_src>
import functools

import jax
import jax.numpy as jnp
from jax.experimental import pallas as pl
from jax.experimental.pallas import tpu as pltpu

VMEM_SPEC = pl.BlockSpec(memory_space=pltpu.MemorySpace.VMEM)
VMEM_LIMIT = 64 * 1024 * 1024   # raise scoped-VMEM ceiling (<= physical on v5e/v6e/v7x)

BN_EPS = 1e-5
LANE = 128
SUBLANE = 8


def _rup(v, m):
    return ((v + m - 1) // m) * m


def _pad2(x, rows, cols):
    x = x.astype(jnp.float32)
    return jnp.pad(x, ((0, rows - x.shape[0]), (0, cols - x.shape[1])))


# --------------------------- graph-prep kernel ------------------------------

def _graph_prep_kernel(soh_ref, doh_ref, we_ref, feat_ref, o_ref, *, order):
    soh = soh_ref[...].astype(jnp.float32)
    doh = doh_ref[...].astype(jnp.float32)
    # block-diagonal learned adjacency built on the MXU:
    #   adj[i, j] = sum_e soh[e, i] * w_e[e] * doh[e, j]
    # (assumes no duplicate directed edges; torch reference is last-write-wins .set)
    adj = jax.lax.dot_general(soh * we_ref[...], doh, (((0,), (0,)), ((), ())),
                              preferred_element_type=jnp.float32)
    n = adj.shape[0]
    row = jax.lax.broadcasted_iota(jnp.int32, (n, n), 0)
    col = jax.lax.broadcasted_iota(jnp.int32, (n, n), 1)
    eye = (row == col).astype(jnp.float32)
    adj = adj + eye
    # degree sums via MXU dots against a ones vector (no O(N^2) VPU reduce passes)
    ones = jnp.ones((n, 1), jnp.float32)
    deg_c = jnp.dot(adj, ones, preferred_element_type=jnp.float32)        # adj.sum(1), column
    deg_r = jax.lax.dot_general(adj, ones, (((0,), (0,)), ((), ())),
                                preferred_element_type=jnp.float32)       # adj.sum(0), column
    r_i = jax.lax.rsqrt(deg_r)                                            # per-row factor
    r_j = jax.lax.rsqrt(jnp.sum(deg_c * eye, axis=0, keepdims=True))      # per-col factor (row)
    a_n = r_i * adj * r_j
    # propagate(feature, A_, order) for the whole batch at once (A_ is block-diagonal)
    x = feat_ref[...]
    y = x
    for _ in range(order):
        x = jnp.dot(a_n, x, preferred_element_type=jnp.float32)
        y = y + x
    o_ref[...] = y * (1.0 / (order + 1.0))


def pallas_graph_prep(soh, doh, w_e, feat, order):
    n_pad, d_pad = feat.shape
    return pl.pallas_call(
        functools.partial(_graph_prep_kernel, order=order),
        out_shape=jax.ShapeDtypeStruct((n_pad, d_pad), jnp.float32),
        in_specs=[VMEM_SPEC] * 4,
        out_specs=VMEM_SPEC,
        compiler_params=pltpu.CompilerParams(vmem_limit_bytes=VMEM_LIMIT),
    )(soh, doh, w_e, feat)


# ------------------- fused GIN layer + virtual-node update ------------------

def _gin_layer_kernel(h_ref, vne_ref, boh_ref, eemb_ref, soh_ref, doh_ref,
                      nmask_ref, gmask_ref, eps_ref,
                      w1_ref, b1_ref, w2_ref, b2_ref,
                      v1_ref, c1_ref, v2_ref, c2_ref,
                      o_ref, vne_out_ref, hin_sc, agg_sc, *, relu_out):
    k = pl.program_id(0)
    nk = pl.num_programs(0)

    @pl.when(k == 0)
    def _():
        # h_in = h + virtualnode_embedding[batch]  (gather as one-hot contraction on MXU)
        boh = boh_ref[...].astype(jnp.float32)
        hin = h_ref[...] + jax.lax.dot_general(
            boh, vne_ref[...], (((0,), (0,)), ((), ())),
            preferred_element_type=jnp.float32)
        hin_sc[...] = hin
        agg_sc[...] = (1.0 + eps_ref[...]) * hin     # init accumulator with self term

    # GIN message passing for this E tile: sum_{e: dst(e)==i} relu(hin[src(e)] + eemb[e])
    soh = soh_ref[...].astype(jnp.float32)
    doh = doh_ref[...].astype(jnp.float32)
    x_src = jnp.dot(soh, hin_sc[...], preferred_element_type=jnp.float32)   # (E_t, D)
    msg = jnp.maximum(x_src + eemb_ref[...], 0.0)
    agg_sc[...] += jax.lax.dot_general(doh, msg, (((0,), (0,)), ((), ())),
                                       preferred_element_type=jnp.float32)  # (N, D)

    @pl.when(k == nk - 1)
    def _():
        # MLP: Linear -> (folded eval BN) -> ReLU -> Linear -> (folded eval BN) [-> ReLU]
        z = jnp.maximum(
            jnp.dot(agg_sc[...], w1_ref[...], preferred_element_type=jnp.float32)
            + b1_ref[...], 0.0)
        out = jnp.dot(z, w2_ref[...], preferred_element_type=jnp.float32) + b2_ref[...]
        if relu_out:
            out = jnp.maximum(out, 0.0)
        o_ref[...] = out * nmask_ref[...]            # keep padded node rows exactly zero
        # fused virtual-node update: global_add_pool(hin) + vne -> 2-layer MLP (ReLU/ReLU)
        boh = boh_ref[...].astype(jnp.float32)
        pooled = jnp.dot(boh, hin_sc[...],
                         preferred_element_type=jnp.float32) + vne_ref[...]
        v = jnp.maximum(
            jnp.dot(pooled, v1_ref[...], preferred_element_type=jnp.float32)
            + c1_ref[...], 0.0)
        vne_new = jnp.maximum(
            jnp.dot(v, v2_ref[...], preferred_element_type=jnp.float32) + c2_ref[...], 0.0)
        vne_out_ref[...] = vne_new * gmask_ref[...]  # keep padded graph rows zero


def pallas_gin_layer(h, vne, boh, eemb, soh, doh, nmask, gmask, eps11,
                     w1, b1, w2, b2, v1, c1, v2, c2, e_tile, relu_out):
    n_pad, d_pad = h.shape
    b_pad = vne.shape[0]
    h2_pad = w1.shape[1]
    e_pad = soh.shape[0]
    res = lambda k: (0, 0)        # resident blocks (fetched once, kept in VMEM)
    stream = lambda k: (k, 0)     # streamed, double-buffered E tiles
    return pl.pallas_call(
        functools.partial(_gin_layer_kernel, relu_out=relu_out),
        out_shape=(jax.ShapeDtypeStruct((n_pad, d_pad), jnp.float32),
                   jax.ShapeDtypeStruct((b_pad, d_pad), jnp.float32)),
        grid=(e_pad // e_tile,),
        in_specs=[
            pl.BlockSpec((n_pad, d_pad), res),      # h
            pl.BlockSpec((b_pad, d_pad), res),      # vne
            pl.BlockSpec((b_pad, n_pad), res),      # boh (bf16)
            pl.BlockSpec((e_tile, d_pad), stream),  # edge embeddings
            pl.BlockSpec((e_tile, n_pad), stream),  # src one-hot tile (bf16)
            pl.BlockSpec((e_tile, n_pad), stream),  # dst one-hot tile (bf16)
            pl.BlockSpec((n_pad, 1), res),          # node mask
            pl.BlockSpec((b_pad, 1), res),          # graph mask
            pl.BlockSpec((1, 1), res),              # eps
            pl.BlockSpec((d_pad, h2_pad), res),     # W1 (BN-folded)
            pl.BlockSpec((1, h2_pad), res),         # b1 (BN-folded)
            pl.BlockSpec((h2_pad, d_pad), res),     # W2 (BN-folded)
            pl.BlockSpec((1, d_pad), res),          # b2 (BN-folded)
            pl.BlockSpec((d_pad, h2_pad), res),     # VN MLP W1
            pl.BlockSpec((1, h2_pad), res),         # VN MLP b1
            pl.BlockSpec((h2_pad, d_pad), res),     # VN MLP W2
            pl.BlockSpec((1, d_pad), res),          # VN MLP b2
        ],
        out_specs=(pl.BlockSpec((n_pad, d_pad), res),
                   pl.BlockSpec((b_pad, d_pad), res)),
        scratch_shapes=[pltpu.VMEM((n_pad, d_pad), jnp.float32),   # hin
                        pltpu.VMEM((n_pad, d_pad), jnp.float32)],  # agg accumulator
        compiler_params=pltpu.CompilerParams(
            dimension_semantics=("arbitrary",),
            vmem_limit_bytes=VMEM_LIMIT),
    )(h, vne, boh, eemb, soh, doh, nmask, gmask, eps11,
      w1, b1, w2, b2, v1, c1, v2, c2)


# ------------------------------ JAX glue -----------------------------------

def encode_sum(tables, idx_int):
    # AtomEncoder / BondEncoder: sum of per-feature embedding lookups (data-dep gathers).
    out = tables[0][idx_int[:, 0]]
    for f in range(1, len(tables)):
        out = out + tables[f][idx_int[:, f]]
    return out.astype(jnp.float32)


def init_params(key, num_layer, emb_dim, edge_hidden,
                num_atom_feats=3, atom_vocab=10, num_bond_feats=2, bond_vocab=5):
    keys = iter(jax.random.split(key, 256))
    nrm = lambda shape: 0.1 * jax.random.normal(next(keys), shape, dtype=jnp.float32)
    params = {
        "atom_tables": [nrm((atom_vocab, emb_dim)) for _ in range(num_atom_feats)],
        "bond_tables_main": [nrm((bond_vocab, edge_hidden)) for _ in range(num_bond_feats)],
        "edge_linear_w": nrm((edge_hidden, 1)),
        "edge_linear_b": nrm((1,)),
        "vn_emb": jnp.zeros((1, emb_dim), jnp.float32),  # torch.nn.init.constant_(..., 0)
        "convs": [], "bns": [], "vn_mlps": [],
    }
    for _ in range(num_layer):
        params["convs"].append({
            "bond_tables": [nrm((bond_vocab, emb_dim)) for _ in range(num_bond_feats)],
            "W1": nrm((emb_dim, 2 * emb_dim)), "b1": nrm((2 * emb_dim,)),
            "bn_g": jnp.ones((2 * emb_dim,), jnp.float32),
            "bn_b": jnp.zeros((2 * emb_dim,), jnp.float32),
            "bn_m": jnp.zeros((2 * emb_dim,), jnp.float32),
            "bn_v": jnp.ones((2 * emb_dim,), jnp.float32),
            "W2": nrm((2 * emb_dim, emb_dim)), "b2": nrm((emb_dim,)),
            "eps": jnp.zeros((1,), jnp.float32),
        })
        params["bns"].append({
            "g": jnp.ones((emb_dim,), jnp.float32), "b": jnp.zeros((emb_dim,), jnp.float32),
            "m": jnp.zeros((emb_dim,), jnp.float32), "v": jnp.ones((emb_dim,), jnp.float32),
        })
    for _ in range(num_layer - 1):
        params["vn_mlps"].append({
            "W1": nrm((emb_dim, 2 * emb_dim)), "b1": nrm((2 * emb_dim,)),
            "W2": nrm((2 * emb_dim, emb_dim)), "b2": nrm((emb_dim,)),
        })
    return params


def gnn_node_virtualnode_forward(params, order, x_int, edge_index, edge_attr_int, batch,
                                 num_graphs, num_layer, residual=False, JK="last"):
    if residual or JK != "last":
        # TODO(synk): residual=True / JK='sum' need per-layer hin in HBM; the fused path
        #             (no hin round-trip) covers the configured residual=False, JK='last'.
        raise NotImplementedError("only the configured JK='last', residual=False path")

    N = x_int.shape[0]
    E = edge_index.shape[1]
    emb_dim = params["vn_emb"].shape[1]
    B = num_graphs

    D_pad = _rup(emb_dim, LANE)
    H2_pad = _rup(2 * emb_dim, LANE)
    N_pad = _rup(N, LANE)                      # lane-dense one-hot / adjacency columns
    B_pad = _rup(B, SUBLANE)
    E_TILE = min(256, _rup(E, SUBLANE))
    E_pad = _rup(E, E_TILE)

    # global one-hots, stored bf16 (0/1 exact), shared by graph-prep and every GIN layer
    soh = jnp.pad(jax.nn.one_hot(edge_index[0], N, dtype=jnp.bfloat16),
                  ((0, E_pad - E), (0, N_pad - N)))
    doh = jnp.pad(jax.nn.one_hot(edge_index[1], N, dtype=jnp.bfloat16),
                  ((0, E_pad - E), (0, N_pad - N)))
    boh = jnp.zeros((B_pad, N_pad), jnp.bfloat16).at[batch, jnp.arange(N)].set(1.0)
    nmask = jnp.zeros((N_pad, 1), jnp.float32).at[:N].set(1.0)
    gmask = jnp.zeros((B_pad, 1), jnp.float32).at[:B].set(1.0)

    # learned edge weights: one XLA matmul + sigmoid over all edges (no edge_hidden padding)
    e_emb_main = encode_sum(params["bond_tables_main"], edge_attr_int)
    w_e = jax.nn.sigmoid(
        jnp.dot(e_emb_main, params["edge_linear_w"],
                precision=jax.lax.Precision.HIGHEST) + params["edge_linear_b"])
    w_e = jnp.pad(w_e, ((0, E_pad - E), (0, 0)))

    # atom features in the final h0 layout (no per-graph reshape / re-pad copies)
    feat = jnp.pad(encode_sum(params["atom_tables"], x_int),
                   ((0, N_pad - N), (0, D_pad - emb_dim)))
    h = pallas_graph_prep(soh, doh, w_e, feat, order)          # (N_pad, D_pad) == h0

    vne = jnp.pad(jnp.tile(params["vn_emb"].astype(jnp.float32), (B, 1)),
                  ((0, B_pad - B), (0, D_pad - emb_dim)))
    zero_vn = (jnp.zeros((D_pad, H2_pad), jnp.float32), jnp.zeros((1, H2_pad), jnp.float32),
               jnp.zeros((H2_pad, D_pad), jnp.float32), jnp.zeros((1, D_pad), jnp.float32))

    for layer in range(num_layer):
        cp, bp = params["convs"][layer], params["bns"][layer]
        eemb = jnp.pad(encode_sum(cp["bond_tables"], edge_attr_int),
                       ((0, E_pad - E), (0, D_pad - emb_dim)))
        # fold eval-mode BatchNorms into the two Linear layers (trace-time algebra)
        s1 = cp["bn_g"] * jax.lax.rsqrt(cp["bn_v"] + BN_EPS)
        w1f = _pad2(cp["W1"] * s1[None, :], D_pad, H2_pad)
        b1f = _pad2(((cp["b1"] - cp["bn_m"]) * s1 + cp["bn_b"]).reshape(1, -1), 1, H2_pad)
        s2 = bp["g"] * jax.lax.rsqrt(bp["v"] + BN_EPS)
        w2f = _pad2(cp["W2"] * s2[None, :], H2_pad, D_pad)
        b2f = _pad2(((cp["b2"] - bp["m"]) * s2 + bp["b"]).reshape(1, -1), 1, D_pad)

        if layer < num_layer - 1:
            vp = params["vn_mlps"][layer]
            vnw = (_pad2(vp["W1"], D_pad, H2_pad), _pad2(vp["b1"].reshape(1, -1), 1, H2_pad),
                   _pad2(vp["W2"], H2_pad, D_pad), _pad2(vp["b2"].reshape(1, -1), 1, D_pad))
        else:
            vnw = zero_vn   # VN update output unused after the last layer

        # TODO(synk): F.dropout is stochastic in training; eval-mode (identity) semantics.
        h, vne = pallas_gin_layer(
            h, vne, boh, eemb, soh, doh, nmask, gmask,
            cp["eps"].reshape(1, 1).astype(jnp.float32),
            w1f, b1f, w2f, b2f, *vnw,
            e_tile=E_TILE, relu_out=(layer != num_layer - 1))

    return h[:N, :emb_dim]


# --------------------------- pure-JAX reference ----------------------------

def ref_forward(params, order, x_int, edge_index, edge_attr_int, batch,
                num_graphs, nodes_per_graph, edges_per_graph, num_layer):
    hp = jax.lax.Precision.HIGHEST

    def lin(x, w, b, act=None):
        y = jnp.dot(x, w, precision=hp) + b
        if act == "relu":
            y = jnp.maximum(y, 0.0)
        elif act == "sigmoid":
            y = jax.nn.sigmoid(y)
        return y

    def bn(x, g, b_, m, v, relu=False):
        y = (x - m) / jnp.sqrt(v + BN_EPS) * g + b_
        return jnp.maximum(y, 0.0) if relu else y

    N = x_int.shape[0]
    vne = jnp.tile(params["vn_emb"], (num_graphs, 1))
    feats = []
    for g in range(num_graphs):
        ns, ne = g * nodes_per_graph, (g + 1) * nodes_per_graph
        es, ee = g * edges_per_graph, (g + 1) * edges_per_graph
        feat = encode_sum(params["atom_tables"], x_int[ns:ne])
        e_emb = encode_sum(params["bond_tables_main"], edge_attr_int[es:ee])
        w_e = lin(e_emb, params["edge_linear_w"], params["edge_linear_b"], "sigmoid").reshape(-1)
        src_l = edge_index[0, es:ee] - ns
        dst_l = edge_index[1, es:ee] - ns
        adj = jnp.zeros((nodes_per_graph, nodes_per_graph), jnp.float32)
        adj = adj.at[src_l, dst_l].set(w_e) + jnp.eye(nodes_per_graph, dtype=jnp.float32)
        deg_col = adj.sum(1)
        deg_row = adj.sum(0)
        A = (deg_row ** -0.5)[:, None] * adj * (deg_col ** -0.5)[None, :]
        x = feat
        y = feat
        for _ in range(order):
            x = jnp.dot(A, x, precision=hp)
            y = y + x
        feats.append(y / (order + 1.0))
    h_list = [jnp.concatenate(feats, axis=0)]

    src, dst = edge_index[0], edge_index[1]
    for layer in range(num_layer):
        h_in = h_list[layer] + vne[batch]
        h_list[layer] = h_in
        cp = params["convs"][layer]
        eemb = encode_sum(cp["bond_tables"], edge_attr_int)
        msg = jnp.maximum(h_in[src] + eemb, 0.0)
        agg = jax.ops.segment_sum(msg, dst, num_segments=N)
        z = lin((1.0 + cp["eps"][0]) * h_in + agg, cp["W1"], cp["b1"])
        z = bn(z, cp["bn_g"], cp["bn_b"], cp["bn_m"], cp["bn_v"], relu=True)
        h = lin(z, cp["W2"], cp["b2"])
        bp = params["bns"][layer]
        h = bn(h, bp["g"], bp["b"], bp["m"], bp["v"], relu=(layer != num_layer - 1))
        h_list.append(h)
        if layer < num_layer - 1:
            pooled = jax.ops.segment_sum(h_in, batch, num_segments=num_graphs) + vne
            vp = params["vn_mlps"][layer]
            vne = lin(lin(pooled, vp["W1"], vp["b1"], "relu"), vp["W2"], vp["b2"], "relu")
    return h_list[-1]


# --------------------------------- main -------------------------------------

if __name__ == "__main__":
    key = jax.random.PRNGKey(0)
    B, Ng, emb_dim, edge_hidden = 2, 8, 32, 16
    num_layer, order = 2, 2
    N = B * Ng

    # synthetic batched graph data (each graph: ring, both edge directions stored)
    k_atom, k_bond, k_param = jax.random.split(key, 3)
    x_int = jax.random.randint(k_atom, (N, 3), 0, 10, dtype=jnp.int32)
    local_src = jnp.arange(Ng, dtype=jnp.int32)
    local_dst = (local_src + 1) % Ng
    src_local = jnp.concatenate([local_src, local_dst])
    dst_local = jnp.concatenate([local_dst, local_src])
    edge_src = jnp.concatenate([src_local + g * Ng for g in range(B)])
    edge_dst = jnp.concatenate([dst_local + g * Ng for g in range(B)])
    edge_index = jnp.stack([edge_src, edge_dst]).astype(jnp.int32)   # (2, 32)
    E = edge_index.shape[1]
    edges_per_graph = E // B
    edge_attr_int = jax.random.randint(k_bond, (E, 2), 0, 5, dtype=jnp.int32)
    batch = jnp.repeat(jnp.arange(B, dtype=jnp.int32), Ng)

    params = init_params(k_param, num_layer, emb_dim, edge_hidden)

    out = gnn_node_virtualnode_forward(
        params, order, x_int, edge_index, edge_attr_int, batch,
        num_graphs=B, num_layer=num_layer)
    out = jax.block_until_ready(out)

    ref = ref_forward(
        params, order, x_int, edge_index, edge_attr_int, batch,
        num_graphs=B, nodes_per_graph=Ng, edges_per_graph=edges_per_graph,
        num_layer=num_layer)

    assert out.shape == (N, emb_dim)
    assert bool(jnp.all(jnp.isfinite(out)))
    assert float(jnp.max(jnp.abs(out - ref))) < 1e-3
    print("KERNEL_OK")
</pallas_src>

<mosaic_0001>
module attributes {stable_mosaic.version = 11 : i64} {
  func.func @_graph_prep_kernel(%arg0: memref<32x128xbf16, #tpu.memory_space<vmem>>, %arg1: memref<32x128xbf16, #tpu.memory_space<vmem>>, %arg2: memref<32x1xf32, #tpu.memory_space<vmem>>, %arg3: memref<128x128xf32, #tpu.memory_space<vmem>>, %arg4: memref<128x128xf32, #tpu.memory_space<vmem>>) attributes {dimension_semantics = [], scalar_prefetch = 0 : i64, scratch_operands = 0 : i64, tpu.core_type = #tpu.core_type<tc>} {
    %c0 = arith.constant 0 : index
    %c0_0 = arith.constant 0 : index
    %0 = vector.load %arg0[%c0, %c0_0] : memref<32x128xbf16, #tpu.memory_space<vmem>>, vector<32x128xbf16>
    %1 = arith.extf %0 : vector<32x128xbf16> to vector<32x128xf32>
    %c0_1 = arith.constant 0 : index
    %c0_2 = arith.constant 0 : index
    %2 = vector.load %arg1[%c0_1, %c0_2] : memref<32x128xbf16, #tpu.memory_space<vmem>>, vector<32x128xbf16>
    %3 = arith.extf %2 : vector<32x128xbf16> to vector<32x128xf32>
    %c0_3 = arith.constant 0 : index
    %c0_4 = arith.constant 0 : index
    %4 = vector.load %arg2[%c0_3, %c0_4] : memref<32x1xf32, #tpu.memory_space<vmem>>, vector<32x1xf32>
    %5 = vector.broadcast %4 : vector<32x1xf32> to vector<32x128xf32>
    %6 = arith.mulf %1, %5 : vector<32x128xf32>
    %cst = arith.constant dense<0.000000e+00> : vector<128x128xf32>
    %7 = tpu.matmul %6, %3, %cst {dimension_numbers = #tpu.dot_dimension_numbers<[0], [0], [1], [1], [0, 1, 1, 1], [], []>} : vector<32x128xf32>, vector<32x128xf32>, vector<128x128xf32> -> vector<128x128xf32>
    %8 = tpu.iota {dimensions = array<i32: 0>} : vector<128x128xi32>
    %9 = tpu.iota {dimensions = array<i32: 1>} : vector<128x128xi32>
    %10 = arith.cmpi eq, %8, %9 : vector<128x128xi32>
    %11 = arith.extui %10 : vector<128x128xi1> to vector<128x128xi32>
    %12 = arith.sitofp %11 : vector<128x128xi32> to vector<128x128xf32>
    %13 = arith.addf %7, %12 : vector<128x128xf32>
    %cst_5 = arith.constant 1.000000e+00 : f32
    %14 = vector.broadcast %cst_5 : f32 to vector<128x1xf32>
    %cst_6 = arith.constant dense<0.000000e+00> : vector<128x1xf32>
    %15 = tpu.matmul %13, %14, %cst_6 {dimension_numbers = #tpu.dot_dimension_numbers<[1], [0], [0], [1], [0, 0, 1, 1], [], []>} : vector<128x128xf32>, vector<128x1xf32>, vector<128x1xf32> -> vector<128x1xf32>
    %cst_7 = arith.constant dense<0.000000e+00> : vector<128x1xf32>
    %16 = tpu.matmul %13, %14, %cst_7 {dimension_numbers = #tpu.dot_dimension_numbers<[0], [0], [1], [1], [0, 1, 1, 1], [], []>} : vector<128x128xf32>, vector<128x1xf32>, vector<128x1xf32> -> vector<128x1xf32>
    %17 = math.rsqrt %16 : vector<128x1xf32>
    %18 = vector.broadcast %15 : vector<128x1xf32> to vector<128x128xf32>
    %19 = arith.mulf %18, %12 : vector<128x128xf32>
    %cst_8 = arith.constant dense<0.000000e+00> : vector<128xf32>
    %20 = vector.multi_reduction <add>, %19, %cst_8 [0] : vector<128x128xf32> to vector<128xf32>
    %21 = vector.shape_cast %20 : vector<128xf32> to vector<1x128xf32>
    %22 = math.rsqrt %21 : vector<1x128xf32>
    %23 = vector.broadcast %17 : vector<128x1xf32> to vector<128x128xf32>
    %24 = arith.mulf %23, %13 : vector<128x128xf32>
    %25 = vector.broadcast %22 : vector<1x128xf32> to vector<128x128xf32>
    %26 = arith.mulf %24, %25 : vector<128x128xf32>
    %c0_9 = arith.constant 0 : index
    %c0_10 = arith.constant 0 : index
    %27 = vector.load %arg3[%c0_9, %c0_10] : memref<128x128xf32, #tpu.memory_space<vmem>>, vector<128x128xf32>
    %cst_11 = arith.constant dense<0.000000e+00> : vector<128x128xf32>
    %28 = tpu.matmul %26, %27, %cst_11 {dimension_numbers = #tpu.dot_dimension_numbers<[1], [0], [0], [1], [0, 0, 1, 1], [], []>} : vector<128x128xf32>, vector<128x128xf32>, vector<128x128xf32> -> vector<128x128xf32>
    %29 = arith.addf %27, %28 : vector<128x128xf32>
    %cst_12 = arith.constant dense<0.000000e+00> : vector<128x128xf32>
    %30 = tpu.matmul %26, %28, %cst_12 {dimension_numbers = #tpu.dot_dimension_numbers<[1], [0], [0], [1], [0, 0, 1, 1], [], []>} : vector<128x128xf32>, vector<128x128xf32>, vector<128x128xf32> -> vector<128x128xf32>
    %31 = arith.addf %29, %30 : vector<128x128xf32>
    %cst_13 = arith.constant 0.333333343 : f32
    %32 = vector.broadcast %cst_13 : f32 to vector<128x128xf32>
    %33 = arith.mulf %31, %32 : vector<128x128xf32>
    %c0_14 = arith.constant 0 : index
    %c0_15 = arith.constant 0 : index
    %34 = vector.load %arg4[%c0_14, %c0_15] : memref<128x128xf32, #tpu.memory_space<vmem>>, vector<128x128xf32>
    tpu.vector_store %arg4[%c0_14, %c0_15], %33 {strides = array<i32>} : memref<128x128xf32, #tpu.memory_space<vmem>>, vector<128x128xf32>,
    return
  }
}

</mosaic_0001>

<bundles_post_ra>
// kernel: tpu_custom_call.1
= control target key start
LH: loop header
LB: loop body
LE: loop exit
PB: predicated region body
PF: predicated region fallthrough
CT: control target
= control target key end

     0   :  { %9 = vsyncpa [#allocation3], 0  ;;  %s2604_s0 = inlined_call_operand.hbm [shape: bf16[32,128], index: 0, kind: input, shape index: {}]   ;;  %s2605_s1 = inlined_call_operand.hbm [shape: bf16[32,128], index: 1, kind: input, shape index: {}]   ;;  %s2606_s2 = inlined_call_operand.hbm [shape: f32[32,1], index: 2, kind: input, shape index: {}]   ;;  %s2607_s3 = inlined_call_operand.hbm [shape: f32[128,128], index: 3, kind: input, shape index: {}]   ;;  %s2608_s4 = inlined_call_operand.hbm [shape: f32[128,128], index: 4, kind: output, shape index: {}]  }
   0x1   :  { %10 = vsyncpa [#allocation6], 0 }
   0x2   :  { %11 = vsyncpa [#allocation9], 0 }
   0x3   :  { %12 = vsyncpa [#allocation4], 0  ;;  %s2107_s15 = smov [#allocation5]   ;;  %s2108_s17 = smov [#allocation2]  }
   0x4   :  { %s30_s16 = sshll.u32 %s2107_s15, 4  ;;  %s18_s18 = sshll.u32 %s2108_s17, 4  ;;  %s31_s16 = int_to_ptr.vmem [resolvable:$true] %s30_s16  ;;  %s2144_s18 = int_to_ptr.vmem [resolvable:$true] %s18_s18 }
   0x5   :  { %s1989_s21 = scalar_lea.hbm %s2605_s1, 256 }
   0x6   :  { %p1990_p0 = scmp.ne.s32.totalorder %s2605_s1, %s1989_s21  ;;  %p1993_p1 = scmp.lt.u32.totalorder %s1989_s21, %s2605_s1 }
   0x8   :  { %p1995_p2 = pnand %p1993_p1, %p1990_p0 }
   0xa   :  { %1998 = shalt.err (!%p1995_p2)
}
   0xb   :  { %s1999_s26 = scalar_lea.vmem %s31_s16, 256  ;;  %p2004_p4 = scmp.lt.s32.totalorder %s31_s16, %s31_s16 }
   0xc   :  { %p2000_p3 = scmp.ne.s32.totalorder %s31_s16, %s1999_s26  ;;  %p2005_p5 = scmp.lt.s32.totalorder %s1999_s26, %s1999_s26 }
   0xe   :  { %p2006_p6 = por %p2005_p5, %p2004_p4 }
  0x10   :  { %p2007_p7 = pnand %p2006_p6, %p2000_p3 }
  0x12   :  { %2010 = shalt.err (!%p2007_p7)
}
  0x13   :  { %s2109_s27 = smov 64   ;;  %s2110_s28 = smov 4  }
  0x14   :  { %36 = dma.hbm_to_vmem [thread:$0]  %s2605_s1, 256, %s31_s16, [#allocation6], %s2109_s27, %s2109_s27, %s2110_s28  }
  0x15   :  { %s2011_s7 = scalar_lea.hbm %s2604_s0, 256 }
  0x16   :  { %p2012_p8 = scmp.ne.s32.totalorder %s2604_s0, %s2011_s7  ;;  %p2015_p9 = scmp.lt.u32.totalorder %s2011_s7, %s2604_s0 }
  0x18   :  { %p2017_p10 = pnand %p2015_p9, %p2012_p8 }
  0x1a   :  { %2020 = shalt.err (!%p2017_p10)
}
  0x1b   :  { %s2021_s12 = scalar_lea.vmem %s2144_s18, 256  ;;  %p2026_p12 = scmp.lt.s32.totalorder %s2144_s18, %s2144_s18 }
  0x1c   :  { %p2022_p11 = scmp.ne.s32.totalorder %s2144_s18, %s2021_s12  ;;  %p2027_p13 = scmp.lt.s32.totalorder %s2021_s12, %s2021_s12 }
  0x1e   :  { %p2028_p0 = por %p2027_p13, %p2026_p12 }
  0x20   :  { %p2029_p1 = pnand %p2028_p0, %p2022_p11 }
  0x22   :  { %2032 = shalt.err (!%p2029_p1)
}
  0x23   :  { %24 = dma.hbm_to_vmem [thread:$0]  %s2604_s0, 256, %s2144_s18, [#allocation3], %s2109_s27, %s2109_s27, %s2110_s28  }
  0x24   :  { %s2111_s14 = smov [#allocation7]   ;;  %s2033_s19 = scalar_lea.hbm %s2606_s2, 512 }
  0x25   :  { %s42_s15 = sshll.u32 %s2111_s14, 4  ;;  %p2034_p2 = scmp.ne.s32.totalorder %s2606_s2, %s2033_s19  ;;  %s43_s15 = int_to_ptr.vmem [resolvable:$true] %s42_s15 }
  0x26   :  { %p2037_p3 = scmp.lt.u32.totalorder %s2033_s19, %s2606_s2 }
  0x28   :  { %p2039_p4 = pnand %p2037_p3, %p2034_p2 }
  0x2a   :  { %2042 = shalt.err (!%p2039_p4)
}
  0x2b   :  { %s2043_s24 = scalar_lea.vmem %s43_s15, 512  ;;  %p2048_p6 = scmp.lt.s32.totalorder %s43_s15, %s43_s15 }
  0x2c   :  { %p2044_p5 = scmp.ne.s32.totalorder %s43_s15, %s2043_s24  ;;  %p2049_p7 = scmp.lt.s32.totalorder %s2043_s24, %s2043_s24 }
  0x2e   :  { %p2050_p8 = por %p2049_p7, %p2048_p6 }
  0x30   :  { %p2051_p9 = pnand %p2050_p8, %p2044_p5 }
  0x32   :  { %2054 = shalt.err (!%p2051_p9)
}
  0x33   :  { %s2112_s0 = smov 128   ;;  %s2113_s18 = smov 8  }
  0x34   :  { %48 = dma.hbm_to_vmem [thread:$0]  %s2606_s2, 512, %s43_s15, [#allocation6], %s2112_s0, %s2112_s0, %s2113_s18  }
  0x35   :  { %s2114_s27 = smov [#allocation8]   ;;  %s2055_s5 = scalar_lea.hbm %s2607_s3, 2048 }
  0x36   :  { %s54_s28 = sshll.u32 %s2114_s27, 4  ;;  %p2056_p10 = scmp.ne.s32.totalorder %s2607_s3, %s2055_s5  ;;  %s55_s28 = int_to_ptr.vmem [resolvable:$true] %s54_s28 }
  0x37   :  { %p2059_p11 = scmp.lt.u32.totalorder %s2055_s5, %s2607_s3 }
  0x39   :  { %p2061_p12 = pnand %p2059_p11, %p2056_p10 }
  0x3b   :  { %2064 = shalt.err (!%p2061_p12)
}
  0x3c   :  { %s2065_s10 = scalar_lea.vmem %s55_s28, 2048  ;;  %p2070_p0 = scmp.lt.s32.totalorder %s55_s28, %s55_s28 }
  0x3d   :  { %p2066_p13 = scmp.ne.s32.totalorder %s55_s28, %s2065_s10  ;;  %p2071_p1 = scmp.lt.s32.totalorder %s2065_s10, %s2065_s10 }
  0x3f   :  { %p2072_p2 = por %p2071_p1, %p2070_p0 }
  0x41   :  { %p2073_p3 = pnand %p2072_p2, %p2066_p13 }
  0x43   :  { %2076 = shalt.err (!%p2073_p3)
}
  0x44   :  { %60 = dma.hbm_to_vmem [thread:$0]  %s2607_s3, 2048, %s55_s28, [#allocation9], %s2112_s0, %s2112_s0, %s2113_s18  }
  0x45   :  { %2099 = dma.done.wait [#allocation3], 256  }
  0x46   :  { %2100 = vsyncadd [#allocation3], 4294967040 }
  0x47   :  { %2101 = dma.done.wait [#allocation6], 768  }
  0x48   :  { %2102 = vsyncadd [#allocation6], 4294966528 }
  0x49   :  { %2103 = dma.done.wait [#allocation9], 2048  }
  0x4a   :  { %2104 = vsyncadd [#allocation9], 4294965248  ;;  %v2115_v0 = vmov 0   ;;  %v89_v1 = vld [vmem:[#allocation7] sm:$0xff]  ;;  %v91_v2 = vld [vmem:[#allocation7 + $0x10] sm:$0xff]  ;;  %vm216_vm0 = vcmask 261120   ;;  %v117_v38 = vlaneseq }
  0x4b   :  { %1953 = vset.pattern.permute.xlu0 %v2115_v0  ;;  %1954 = vset.pattern.permute.xlu1 %v2115_v0  ;;  %v90_v3 = vld [vmem:[#allocation7 + $0x8] sm:$0xff]  ;;  %v92_v4 = vld [vmem:[#allocation7 + $0x18] sm:$0xff]  ;;  %v1408_v5 = vld [vmem:[#allocation5] sm:$0xff]   ;;  %v2116_v21 = vmov 1.0|1.0   ;;  %v2117_v42 = vmov 0.0  }
  0x4c   :  { %95 = vperm.xlu0 %1953, %v89_v1   ;;  %105 = vperm.xlu1 %1954, %v91_v2   ;;  %v1400_v6 = vld [vmem:[#allocation2] sm:$0xff]   ;;  %v1415_v9 = vld [vmem:[#allocation2 + $0x8] sm:$0xff]   ;;  %v1416_v13 = vld [vmem:[#allocation5 + $0x8] sm:$0xff]   ;;  %v2221_v39 = vshrl.u32 %v117_v38, 7  ;;  %v2223_v40 = vand.u32 127, %v117_v38  ;;  %s2118_s3 = smov [#allocation10]  }
  0x4d   :  { %1822 = vmatprep.subr.bf16.mxu0 %v1408_v5  ;;  %v1401_v7 = vunpack.c.l.bf16 %v1400_v6  ;;  %v1402_v11 = vunpack.c.h.bf16 %v1400_v6  ;;  %v1405_v12 = vunpack.c.l.bf16 %v1415_v9  ;;  %v1406_v18 = vunpack.c.h.bf16 %v1415_v9  ;;  %1829 = vmatprep.subr.bf16.mxu1 %v2116_v21  ;;  %s1353_s12 = sshll.u32 %s2118_s3, 4  ;;  %s1354_s12 = int_to_ptr.vmem [resolvable:$true] %s1353_s12 }
  0x4e   :  { %1824 = vmatpush3.bf16.msra.mxu0 %v1408_v5  ;;  %1830 = vmatpush3.bf16.msra.mxu1 %v2116_v21  ;;  %v119_v41 = vadd.s32 8, %v2221_v39  ;;  %vm136_vm1 = vcmp.eq.s32.totalorder %v2221_v39, %v2223_v40  ;;  %v120_v46 = vadd.s32 16, %v2221_v39  ;;  %v121_v48 = vadd.s32 24, %v2221_v39  ;;  %s2077_s1 = scalar_lea.vmem %s1354_s12, 2048  ;;  %p2082_p5 = scmp.lt.s32.totalorder %s1354_s12, %s1354_s12 }
  0x4f   :  { %1826 = vmatprep.subr.bf16.mxu0 %v1416_v13  ;;  %1831 = vmatprep.subr.bf16.mxu1 %v2116_v21  ;;  %v2230_v43 = vsel %vm136_vm1, 1.0, %v2117_v42  ;;  %v122_v54 = vadd.s32 32, %v2221_v39  ;;  %v123_v56 = vadd.s32 40, %v2221_v39  ;;  %v124_v62 = vadd.s32 48, %v2221_v39  ;;  %p2078_p4 = scmp.ne.s32.totalorder %s1354_s12, %s2077_s1  ;;  %p2083_p6 = scmp.lt.s32.totalorder %s2077_s1, %s2077_s1 }
  0x50   :  { %100 = vperm.xlu0 %1953, %v90_v3   ;;  %110 = vperm.xlu1 %1954, %v92_v4   ;;  %vm137_vm2 = vcmp.eq.s32.totalorder %v119_v41, %v2223_v40  ;;  %vm138_vm3 = vcmp.eq.s32.totalorder %v120_v46, %v2223_v40  ;;  %vm139_vm4 = vcmp.eq.s32.totalorder %v121_v48, %v2223_v40  ;;  %v125_v0 = vadd.s32 56, %v2221_v39 }
  0x51   :  { %v2233_v44 = vsel %vm137_vm2, 1.0, %v2117_v42  ;;  %v2249_v51 = vsel %vm138_vm3, 1.0, %v2117_v42  ;;  %v2253_v52 = vsel %vm139_vm4, 1.0, %v2117_v42  ;;  %vm140_vm5 = vcmp.eq.s32.totalorder %v122_v54, %v2223_v40  ;;  %p2084_p7 = por %p2083_p6, %p2082_p5 }
  0x52   :  { %1828 = vmatpush3.bf16.msra.mxu0 %v1416_v13  ;;  %1832 = vmatpush3.bf16.msra.mxu1 %v2116_v21  ;;  %vm141_vm6 = vcmp.eq.s32.totalorder %v123_v56, %v2223_v40  ;;  %v2269_v59 = vsel %vm140_vm5, 1.0, %v2117_v42  ;;  %vm142_vm7 = vcmp.eq.s32.totalorder %v124_v62, %v2223_v40  ;;  %vm143_vm8 = vcmp.eq.s32.totalorder %v125_v0, %v2223_v40 }
  0x53   :  { %1845 = vmatprep.subr.bf16.mxu0 %v2116_v21  ;;  %1833 = vmatprep.subr.bf16.mxu1 %v2116_v21  ;;  %v2273_v60 = vsel %vm141_vm6, 1.0, %v2117_v42  ;;  %v2289_v3 = vsel %vm142_vm7, 1.0, %v2117_v42  ;;  %v2293_v4 = vsel %vm143_vm8, 1.0, %v2117_v42  ;;  %v126_v6 = vadd.s32 64, %v2221_v39  ;;  %p2085_p8 = pnand %p2084_p7, %p2078_p4 }
  0x55   :  { %vm144_vm9 = vcmp.eq.s32.totalorder %v126_v6, %v2223_v40 }
  0x56   :  { %1834 = vmatpush3.bf16.msra.mxu1 %v2116_v21 }
  0x57   :  { %1835 = vmatprep.subr.bf16.mxu1 %v2116_v21 }
  0x5a   :  { %1836 = vmatpush3.bf16.msra.mxu1 %v2116_v21 }
  0x5b   :  { %1837 = vmatprep.subr.bf16.mxu1 %v2116_v21 }
  0x5e   :  { %1838 = vmatpush3.bf16.msra.mxu1 %v2116_v21 }
  0x5f   :  { %1839 = vmatprep.subr.bf16.mxu1 %v2116_v21 }
  0x62   :  { %1840 = vmatpush3.bf16.msra.mxu1 %v2116_v21 }
  0x63   :  { %1841 = vmatprep.subr.bf16.mxu1 %v2116_v21 }
  0x66   :  { %1842 = vmatpush3.bf16.msra.mxu1 %v2116_v21 }
  0x67   :  { %1843 = vmatprep.subr.bf16.mxu1 %v2116_v21 }
  0x6a   :  { %1844 = vmatpush3.bf16.msra.mxu1 %v2116_v21 }
  0xcb   :  { %v96_v8 = vpop.permute.xlu0 %95  ;;  %v106_v14 = vpop.permute.xlu1 %105 }
  0xcc   :  { %v113_v10 = vmul.f32 %v1401_v7, %v96_v8  ;;  %v115_v17 = vmul.f32 %v1405_v12, %v106_v14  ;;  %v127_v8 = vadd.s32 72, %v2221_v39  ;;  %v128_v14 = vadd.s32 80, %v2221_v39 }
  0xce   :  { %184 = vxpose.xlu0.b32.start [1/4] (short) %v113_v10, 128  ;;  %vm145_vm10 = vcmp.eq.s32.totalorder %v127_v8, %v2223_v40  ;;  %vm146_vm11 = vcmp.eq.s32.totalorder %v128_v14, %v2223_v40 }
  0xcf   :  { %v101_v15 = vpop.permute.xlu0 %100  ;;  %v111_v19 = vpop.permute.xlu1 %110  ;;  %v2313_v12 = vsel %vm145_vm10, 1.0, %v2117_v42 }
  0xd0   :  { %v114_v16 = vmul.f32 %v1402_v11, %v101_v15  ;;  %v116_v20 = vmul.f32 %v1406_v18, %v111_v19  ;;  %v2309_v11 = vsel %vm144_vm9, 1.0, %v2117_v42  ;;  %v2329_v19 = vsel %vm146_vm11, 1.0, %v2117_v42 }
  0xd2   :  { %185 = vxpose.xlu0.b32.cont [2/4] (short) %v114_v16, 128  ;;  %v129_v16 = vadd.s32 88, %v2221_v39 }
  0xd4   :  { %vm147_vm12 = vcmp.eq.s32.totalorder %v129_v16, %v2223_v40 }
  0xd6   :  { %186 = vxpose.xlu0.b32.cont [3/4] (short) %v115_v17, 128 }
  0xda   :  { %187 = vxpose.xlu0.b32.end [4/4] (short) %v116_v20, 128  ;;  %v2333_v20 = vsel %vm147_vm12, 1.0, %v2117_v42 }
 0x14e   :  { %v200_v22 = vpop.trf.xlu0 }
 0x14f   :  { %1573 = vmatprep.mubr.msk.f32.mxu0 %vm216_vm0, %v200_v22  ;;  %v130_v22 = vadd.s32 96, %v2221_v39 }
 0x151   :  { %vm148_vm13 = vcmp.eq.s32.totalorder %v130_v22, %v2223_v40 }
 0x152   :  { %v201_v23 = vpop.trf.xlu0 }
 0x153   :  { %1574 = vmatmul.mubr.msk.f32.vlgmr.msra.gmra.mrb[0].mxu0 %vm216_vm0, %v201_v23 }
 0x154   :  { %1846 = vmatpush3.bf16.msra.mxu0 %v2116_v21 }
 0x155   :  { %1847 = vmatprep.subr.bf16.mxu0 %v2116_v21 }
 0x156   :  { %v202_v24 = vpop.trf.xlu0 }
 0x157   :  { %1576 = vmatprep.mubr.msk.f32.mxu0 %vm216_vm0, %v202_v24  ;;  %v131_v24 = vadd.s32 104, %v2221_v39 }
 0x158   :  { %1848 = vmatpush3.bf16.msra.mxu0 %v2116_v21 }
 0x159   :  { %1849 = vmatprep.subr.bf16.mxu0 %v2116_v21  ;;  %vm149_vm14 = vcmp.eq.s32.totalorder %v131_v24, %v2223_v40 }
 0x15a   :  { %v203_v25 = vpop.trf.xlu0 }
 0x15b   :  { %1577 = vmatmul.mubr.msk.f32.gmra.mrb[2].mxu0 %vm216_vm0, %v203_v25 }
 0x15c   :  { %1850 = vmatpush3.bf16.msra.mxu0 %v2116_v21 }
 0x15d   :  { %1851 = vmatprep.subr.bf16.mxu0 %v2116_v21 }
 0x15e   :  { %v204_v26 = vpop.trf.xlu0 }
 0x15f   :  { %1579 = vmatprep.mubr.msk.f32.mxu0 %vm216_vm0, %v204_v26 }
 0x160   :  { %1852 = vmatpush3.bf16.msra.mxu0 %v2116_v21 }
 0x161   :  { %1853 = vmatprep.subr.bf16.mxu0 %v2116_v21 }
 0x162   :  { %v205_v27 = vpop.trf.xlu0 }
 0x163   :  { %1580 = vmatmul.mubr.msk.f32.gmra.mrb[4].mxu0 %vm216_vm0, %v205_v27  ;;  %v2349_v27 = vsel %vm148_vm13, 1.0, %v2117_v42 }
 0x164   :  { %1854 = vmatpush3.bf16.msra.mxu0 %v2116_v21 }
 0x165   :  { %1855 = vmatprep.subr.bf16.mxu0 %v2116_v21 }
 0x166   :  { %v206_v28 = vpop.trf.xlu0 }
 0x167   :  { %1582 = vmatprep.mubr.msk.f32.mxu0 %vm216_vm0, %v206_v28  ;;  %v2353_v28 = vsel %vm149_vm14, 1.0, %v2117_v42 }
 0x168   :  { %1856 = vmatpush3.bf16.msra.mxu0 %v2116_v21 }
 0x169   :  { %1857 = vmatprep.subr.bf16.mxu0 %v2116_v21 }
 0x16a   :  { %v207_v29 = vpop.trf.xlu0 }
 0x16b   :  { %1583 = vmatmul.mubr.msk.f32.gmra.mrb[6].mxu0 %vm216_vm0, %v207_v29 }
 0x16c   :  { %1858 = vmatpush3.bf16.msra.mxu0 %v2116_v21 }
 0x16d   :  { %1859 = vmatprep.subr.bf16.mxu0 %v2116_v21 }
 0x16e   :  { %v208_v30 = vpop.trf.xlu0 }
 0x16f   :  { %1585 = vmatprep.mubr.msk.f32.mxu0 %vm216_vm0, %v208_v30  ;;  %v132_v30 = vadd.s32 112, %v2221_v39 }
 0x170   :  { %1860 = vmatpush3.bf16.msra.mxu0 %v2116_v21 }
 0x171   :  { %vm150_vm15 = vcmp.eq.s32.totalorder %v132_v30, %v2223_v40 }
 0x172   :  { %v209_v31 = vpop.trf.xlu0 }
 0x173   :  { %1586 = vmatmul.mubr.msk.f32.gmra.mrb[8].mxu0 %vm216_vm0, %v209_v31 }
 0x176   :  { %v210_v32 = vpop.trf.xlu0 }
 0x177   :  { %1588 = vmatprep.mubr.msk.f32.mxu0 %vm216_vm0, %v210_v32  ;;  %v133_v32 = vadd.s32 120, %v2221_v39 }
 0x17a   :  { %v211_v33 = vpop.trf.xlu0 }
 0x17b   :  { %1589 = vmatmul.mubr.msk.f32.gmra.mrb[10].mxu0 %vm216_vm0, %v211_v33 }
 0x17e   :  { %v212_v34 = vpop.trf.xlu0 }
 0x17f   :  { %1591 = vmatprep.mubr.msk.f32.mxu0 %vm216_vm0, %v212_v34 }
 0x182   :  { %v213_v35 = vpop.trf.xlu0 }
 0x183   :  { %1592 = vmatmul.mubr.msk.f32.gmra.mrb[12].mxu0 %vm216_vm0, %v213_v35  ;;  %v2369_v35 = vsel %vm150_vm15, 1.0, %v2117_v42 }
 0x186   :  { %v214_v36 = vpop.trf.xlu0 }
 0x187   :  { %1594 = vmatprep.mubr.msk.f32.mxu0 %vm216_vm0, %v214_v36 }
 0x18a   :  { %v215_v37 = vpop.trf.xlu0 }
 0x18b   :  { %1595 = vmatmul.mubr.msk.f32.gmra.mrb[14].mxu0 %vm216_vm0, %v215_v37  ;;  %vm151_vm0 = vcmp.eq.s32.totalorder %v133_v32, %v2223_v40 }
 0x18c   :  { %v2373_v36 = vsel %vm151_vm0, 1.0, %v2117_v42 }
 0x226   :  { %v1575_v45 = vpop.f32.mrb[0].mxu0 }
 0x227   :  { %v331_v47 = vpop.f32.mrb[1].mxu0  ;;  %v2241_v50 = vadd.f32 %v1575_v45, %v2233_v44 }
 0x228   :  { %v2238_v49 = vadd.f32 %v2230_v43, %v331_v47 }
 0x22a   :  { %555 = vxpose.xlu1.b32.start [1/16] %v2238_v49, 128  ;;  %1629 = vmatprep.mubr.f32.mxu1 %v2238_v49 }
 0x22b   :  { %1630 = vmatmul.mubr.f32.vlgmr.msra.gmra.mrb[0].mxu1 %v2241_v50 }
 0x22e   :  { %556 = vxpose.xlu1.b32.cont [2/16] %v2241_v50, 128  ;;  %v1578_v53 = vpop.f32.mrb[2].mxu0 }
 0x22f   :  { %v341_v55 = vpop.f32.mrb[3].mxu0  ;;  %v2261_v58 = vadd.f32 %v1578_v53, %v2253_v52 }
 0x230   :  { %v2258_v57 = vadd.f32 %v2249_v51, %v341_v55 }
 0x232   :  { %557 = vxpose.xlu1.b32.cont [3/16] %v2258_v57, 128  ;;  %1632 = vmatprep.mubr.f32.mxu1 %v2258_v57 }
 0x233   :  { %1633 = vmatmul.mubr.f32.gmra.mrb[2].mxu1 %v2261_v58 }
 0x236   :  { %558 = vxpose.xlu1.b32.cont [4/16] %v2261_v58, 128  ;;  %v1581_v61 = vpop.f32.mrb[4].mxu0 }
 0x237   :  { %v351_v63 = vpop.f32.mrb[5].mxu0  ;;  %v2281_v2 = vadd.f32 %v1581_v61, %v2273_v60 }
 0x238   :  { %v2278_v1 = vadd.f32 %v2269_v59, %v351_v63 }
 0x23a   :  { %559 = vxpose.xlu1.b32.cont [5/16] %v2278_v1, 128  ;;  %1635 = vmatprep.mubr.f32.mxu1 %v2278_v1 }
 0x23b   :  { %1636 = vmatmul.mubr.f32.gmra.mrb[4].mxu1 %v2281_v2 }
 0x23e   :  { %560 = vxpose.xlu1.b32.cont [6/16] %v2281_v2, 128  ;;  %v1584_v5 = vpop.f32.mrb[6].mxu0 }
 0x23f   :  { %v361_v7 = vpop.f32.mrb[7].mxu0  ;;  %v2301_v10 = vadd.f32 %v1584_v5, %v2293_v4 }
 0x240   :  { %v2298_v9 = vadd.f32 %v2289_v3, %v361_v7 }
 0x242   :  { %561 = vxpose.xlu1.b32.cont [7/16] %v2298_v9, 128  ;;  %1638 = vmatprep.mubr.f32.mxu1 %v2298_v9 }
 0x243   :  { %1639 = vmatmul.mubr.f32.gmra.mrb[6].mxu1 %v2301_v10 }
 0x246   :  { %562 = vxpose.xlu1.b32.cont [8/16] %v2301_v10, 128  ;;  %v1587_v13 = vpop.f32.mrb[8].mxu0 }
 0x247   :  { %v371_v15 = vpop.f32.mrb[9].mxu0  ;;  %v2321_v18 = vadd.f32 %v1587_v13, %v2313_v12 }
 0x248   :  { %v2318_v17 = vadd.f32 %v2309_v11, %v371_v15 }
 0x24a   :  { %563 = vxpose.xlu1.b32.cont [9/16] %v2318_v17, 128  ;;  %1641 = vmatprep.mubr.f32.mxu1 %v2318_v17 }
 0x24b   :  { %1642 = vmatmul.mubr.f32.gmra.mrb[8].mxu1 %v2321_v18 }
 0x24e   :  { %564 = vxpose.xlu1.b32.cont [10/16] %v2321_v18, 128  ;;  %v1590_v21 = vpop.f32.mrb[10].mxu0 }
 0x24f   :  { %v381_v23 = vpop.f32.mrb[11].mxu0  ;;  %v2341_v26 = vadd.f32 %v1590_v21, %v2333_v20 }
 0x250   :  { %v2338_v25 = vadd.f32 %v2329_v19, %v381_v23 }
 0x252   :  { %565 = vxpose.xlu1.b32.cont [11/16] %v2338_v25, 128  ;;  %1644 = vmatprep.mubr.f32.mxu1 %v2338_v25 }
 0x253   :  { %1645 = vmatmul.mubr.f32.gmra.mrb[10].mxu1 %v2341_v26 }
 0x256   :  { %566 = vxpose.xlu1.b32.cont [12/16] %v2341_v26, 128  ;;  %v1593_v29 = vpop.f32.mrb[12].mxu0 }
 0x257   :  { %v391_v31 = vpop.f32.mrb[13].mxu0  ;;  %v2361_v34 = vadd.f32 %v1593_v29, %v2353_v28 }
 0x258   :  { %v2358_v33 = vadd.f32 %v2349_v27, %v391_v31 }
 0x25a   :  { %567 = vxpose.xlu1.b32.cont [13/16] %v2358_v33, 128  ;;  %1647 = vmatprep.mubr.f32.mxu1 %v2358_v33 }
 0x25b   :  { %1648 = vmatmul.mubr.f32.gmra.mrb[12].mxu1 %v2361_v34 }
 0x25e   :  { %568 = vxpose.xlu1.b32.cont [14/16] %v2361_v34, 128  ;;  %v1596_v37 = vpop.f32.mrb[14].mxu0 }
 0x25f   :  { %v401_v38 = vpop.f32.mrb[15].mxu0  ;;  %v2379_v41 = vadd.f32 %v1596_v37, %v2373_v36 }
 0x260   :  { %v2376_v39 = vadd.f32 %v2369_v35, %v401_v38 }
 0x262   :  { %569 = vxpose.xlu1.b32.cont [15/16] %v2376_v39, 128  ;;  %1650 = vmatprep.mubr.f32.mxu1 %v2376_v39 }
 0x263   :  { %1651 = vmatmul.mubr.f32.gmra.mrb[14].mxu1 %v2379_v41 }
 0x266   :  { %570 = vxpose.xlu1.b32.end [16/16] %v2379_v41, 128 }
 0x2aa   :  { %v571_v40 = vpop.trf.xlu1 }
 0x2ab   :  { %1685 = vmatprep.mubr.f32.mxu0 %v571_v40  ;;  %v2385_v40 = vld [vmem:[#allocation8] sm:$0xff] }
 0x2ae   :  { %v572_v42 = vpop.trf.xlu1 }
 0x2af   :  { %1686 = vmatmul.mubr.f32.vlgmr.msra.gmra.mrb[16].mxu0 %v572_v42  ;;  %v2387_v42 = vld [vmem:[#allocation8 + $0x8] sm:$0xff] }
 0x2b2   :  { %v573_v45 = vpop.trf.xlu1 }
 0x2b3   :  { %1688 = vmatprep.mubr.f32.mxu0 %v573_v45  ;;  %v2389_v45 = vld [vmem:[#allocation8 + $0x10] sm:$0xff] }
 0x2b6   :  { %v574_v46 = vpop.trf.xlu1 }
 0x2b7   :  { %1689 = vmatmul.mubr.f32.gmra.mrb[18].mxu0 %v574_v46  ;;  %v1861_v46 = vpack.c.bf16 %v2387_v42, %v2385_v40 }
 0x2b9   :  { %1862 = vmatprep.subr.bf16.mxu1 %v1861_v46 }
 0x2ba   :  { %v575_v47 = vpop.trf.xlu1  ;;  %1864 = vmatpush3.bf16.msra.mxu1 %v1861_v46 }
 0x2bb   :  { %1691 = vmatprep.mubr.f32.mxu0 %v575_v47  ;;  %v2393_v47 = vld [vmem:[#allocation8 + $0x18] sm:$0xff] }
 0x2be   :  { %v576_v48 = vpop.trf.xlu1 }
 0x2bf   :  { %1692 = vmatmul.mubr.f32.gmra.mrb[20].mxu0 %v576_v48  ;;  %v1865_v48 = vpack.c.bf16 %v2393_v47, %v2389_v45 }
 0x2c1   :  { %1866 = vmatprep.subr.bf16.mxu1 %v1865_v48 }
 0x2c2   :  { %v577_v53 = vpop.trf.xlu1  ;;  %1868 = vmatpush3.bf16.msra.mxu1 %v1865_v48 }
 0x2c3   :  { %1694 = vmatprep.mubr.f32.mxu0 %v577_v53  ;;  %v2397_v53 = vld [vmem:[#allocation8 + $0x20] sm:$0xff] }
 0x2c6   :  { %v578_v54 = vpop.trf.xlu1 }
 0x2c7   :  { %1695 = vmatmul.mubr.f32.gmra.mrb[22].mxu0 %v578_v54  ;;  %v2399_v54 = vld [vmem:[#allocation8 + $0x28] sm:$0xff] }
 0x2ca   :  { %v579_v55 = vpop.trf.xlu1 }
 0x2cb   :  { %1697 = vmatprep.mubr.f32.mxu0 %v579_v55  ;;  %v1869_v55 = vpack.c.bf16 %v2399_v54, %v2397_v53 }
 0x2cd   :  { %1870 = vmatprep.subr.bf16.mxu1 %v1869_v55 }
 0x2ce   :  { %v580_v56 = vpop.trf.xlu1  ;;  %1872 = vmatpush3.bf16.msra.mxu1 %v1869_v55 }
 0x2cf   :  { %1698 = vmatmul.mubr.f32.gmra.mrb[24].mxu0 %v580_v56  ;;  %v2403_v56 = vld [vmem:[#allocation8 + $0x30] sm:$0xff] }
 0x2d2   :  { %v581_v61 = vpop.trf.xlu1 }
 0x2d3   :  { %1700 = vmatprep.mubr.f32.mxu0 %v581_v61  ;;  %v2405_v61 = vld [vmem:[#allocation8 + $0x38] sm:$0xff] }
 0x2d6   :  { %v582_v62 = vpop.trf.xlu1 }
 0x2d7   :  { %1701 = vmatmul.mubr.f32.gmra.mrb[26].mxu0 %v582_v62  ;;  %v1873_v62 = vpack.c.bf16 %v2405_v61, %v2403_v56 }
 0x2d9   :  { %1874 = vmatprep.subr.bf16.mxu1 %v1873_v62 }
 0x2da   :  { %v583_v63 = vpop.trf.xlu1  ;;  %1876 = vmatpush3.bf16.msra.mxu1 %v1873_v62 }
 0x2db   :  { %1703 = vmatprep.mubr.f32.mxu0 %v583_v63  ;;  %v2409_v63 = vld [vmem:[#allocation8 + $0x40] sm:$0xff] }
 0x2de   :  { %v584_v0 = vpop.trf.xlu1 }
 0x2df   :  { %1704 = vmatmul.mubr.f32.gmra.mrb[28].mxu0 %v584_v0  ;;  %v2411_v0 = vld [vmem:[#allocation8 + $0x48] sm:$0xff] }
 0x2e2   :  { %v585_v5 = vpop.trf.xlu1 }
 0x2e3   :  { %1706 = vmatprep.mubr.f32.mxu0 %v585_v5  ;;  %v1877_v5 = vpack.c.bf16 %v2411_v0, %v2409_v63 }
 0x2e5   :  { %1878 = vmatprep.subr.bf16.mxu1 %v1877_v5 }
 0x2e6   :  { %v586_v6 = vpop.trf.xlu1  ;;  %1880 = vmatpush3.bf16.msra.mxu1 %v1877_v5 }
 0x2e7   :  { %1707 = vmatmul.mubr.f32.gmra.mrb[30].mxu0 %v586_v6  ;;  %v2415_v6 = vld [vmem:[#allocation8 + $0x50] sm:$0xff] }
 0x2fe   :  { %v1631_v7 = vpop.f32.mrb[0].mxu1 }
 0x2ff   :  { %v476_v8 = vpop.f32.mrb[1].mxu1  ;;  %755 = vperm.xlu1 %1954, %v1631_v7   ;;  %v2417_v7 = vld [vmem:[#allocation8 + $0x58] sm:$0xff] }
 0x300   :  { %750 = vperm.xlu0 %1953, %v476_v8   ;;  %v1881_v8 = vpack.c.bf16 %v2417_v7, %v2415_v6 }
 0x302   :  { %1882 = vmatprep.subr.bf16.mxu1 %v1881_v8 }
 0x303   :  { %1884 = vmatpush3.bf16.msra.mxu1 %v1881_v8 }
 0x306   :  { %v1634_v13 = vpop.f32.mrb[2].mxu1 }
 0x307   :  { %v486_v14 = vpop.f32.mrb[3].mxu1  ;;  %765 = vperm.xlu1 %1954, %v1634_v13   ;;  %v2421_v13 = vld [vmem:[#allocation8 + $0x60] sm:$0xff] }
 0x308   :  { %760 = vperm.xlu0 %1953, %v486_v14   ;;  %2610 = vst [vmem:[#allocation15_spill] sm:$0xff] %v2421_v13  ;;  %v2423_v14 = vld [vmem:[#allocation8 + $0x68] sm:$0xff] }
 0x30e   :  { %v1637_v15 = vpop.f32.mrb[4].mxu1 }
 0x30f   :  { %v496_v16 = vpop.f32.mrb[5].mxu1  ;;  %775 = vperm.xlu1 %1954, %v1637_v15   ;;  %v1885_v15 = vpack.c.bf16 %v2423_v14, %v2421_v13 }
 0x310   :  { %770 = vperm.xlu0 %1953, %v496_v16  }
 0x311   :  { %1886 = vmatprep.subr.bf16.mxu1 %v1885_v15 }
 0x312   :  { %1888 = vmatpush3.bf16.msra.mxu1 %v1885_v15 }
 0x316   :  { %v1640_v21 = vpop.f32.mrb[6].mxu1 }
 0x317   :  { %v506_v22 = vpop.f32.mrb[7].mxu1  ;;  %785 = vperm.xlu1 %1954, %v1640_v21  }
 0x318   :  { %780 = vperm.xlu0 %1953, %v506_v22  }
 0x31e   :  { %v1643_v23 = vpop.f32.mrb[8].mxu1 }
 0x31f   :  { %v516_v24 = vpop.f32.mrb[9].mxu1  ;;  %795 = vperm.xlu1 %1954, %v1643_v23  }
 0x320   :  { %790 = vperm.xlu0 %1953, %v516_v24  }
 0x326   :  { %v1646_v29 = vpop.f32.mrb[10].mxu1 }
 0x327   :  { %v526_v30 = vpop.f32.mrb[11].mxu1  ;;  %805 = vperm.xlu1 %1954, %v1646_v29   ;;  %v2427_v29 = vld [vmem:[#allocation8 + $0x70] sm:$0xff] }
 0x328   :  { %800 = vperm.xlu0 %1953, %v526_v30   ;;  %v2429_v30 = vld [vmem:[#allocation8 + $0x78] sm:$0xff] }
 0x32e   :  { %v1649_v31 = vpop.f32.mrb[12].mxu1 }
 0x32f   :  { %v536_v32 = vpop.f32.mrb[13].mxu1  ;;  %815 = vperm.xlu1 %1954, %v1649_v31  }
 0x330   :  { %810 = vperm.xlu0 %1953, %v536_v32   ;;  %v1889_v32 = vpack.c.bf16 %v2429_v30, %v2427_v29 }
 0x332   :  { %1890 = vmatprep.subr.bf16.mxu1 %v1889_v32 }
 0x333   :  { %1892 = vmatpush3.bf16.msra.mxu1 %v1889_v32 }
 0x336   :  { %v1652_v37 = vpop.f32.mrb[14].mxu1 }
 0x337   :  { %825 = vperm.xlu1 %1954, %v1652_v37   ;;  %v546_v38 = vpop.f32.mrb[15].mxu1 }
 0x338   :  { %820 = vperm.xlu0 %1953, %v546_v38  }
 0x382   :  { %v1687_v16 = vpop.f32.mrb[16].mxu0 }
 0x383   :  { %1955 = vrsqrt.f32 %v1687_v16  ;;  %v653_v21 = vpop.f32.mrb[17].mxu0 }
 0x384   :  { %1957 = vrsqrt.f32 %v653_v21 }
 0x38a   :  { %v1690_v22 = vpop.f32.mrb[18].mxu0 }
 0x38b   :  { %1959 = vrsqrt.f32 %v1690_v22  ;;  %v663_v23 = vpop.f32.mrb[19].mxu0 }
 0x38c   :  { %1961 = vrsqrt.f32 %v663_v23 }
 0x38d   :  { %v1956_v24 = vpop.eup %1955 }
 0x38e   :  { %v1958_v31 = vpop.eup %1957  ;;  %873 = vperm.xlu1 %1954, %v1956_v24  }
 0x38f   :  { %868 = vperm.xlu0 %1953, %v1958_v31  }
 0x392   :  { %v1693_v37 = vpop.f32.mrb[20].mxu0 }
 0x393   :  { %1963 = vrsqrt.f32 %v1693_v37  ;;  %v673_v38 = vpop.f32.mrb[21].mxu0 }
 0x394   :  { %1965 = vrsqrt.f32 %v673_v38 }
 0x395   :  { %v1960_v46 = vpop.eup %1959 }
 0x396   :  { %v1962_v48 = vpop.eup %1961  ;;  %883 = vperm.xlu1 %1954, %v1960_v46  }
 0x397   :  { %878 = vperm.xlu0 %1953, %v1962_v48  }
 0x39a   :  { %v1696_v55 = vpop.f32.mrb[22].mxu0 }
 0x39b   :  { %1967 = vrsqrt.f32 %v1696_v55  ;;  %v683_v62 = vpop.f32.mrb[23].mxu0  ;;  %v751_v55 = vpop.permute.xlu0 %750 }
 0x39c   :  { %1969 = vrsqrt.f32 %v683_v62  ;;  %v756_v62 = vpop.permute.xlu1 %755 }
 0x39d   :  { %v1964_v5 = vpop.eup %1963 }
 0x39e   :  { %v1966_v8 = vpop.eup %1965  ;;  %893 = vperm.xlu1 %1954, %v1964_v5  }
 0x39f   :  { %888 = vperm.xlu0 %1953, %v1966_v8   ;;  %v761_v8 = vpop.permute.xlu0 %760 }
 0x3a2   :  { %v1699_v15 = vpop.f32.mrb[24].mxu0 }
 0x3a3   :  { %1971 = vrsqrt.f32 %v1699_v15  ;;  %v693_v16 = vpop.f32.mrb[25].mxu0 }
 0x3a4   :  { %1973 = vrsqrt.f32 %v693_v16  ;;  %v829_v16 = vmul.f32 %v2233_v44, %v756_v62 }
 0x3a5   :  { %v1968_v21 = vpop.eup %1967 }
 0x3a6   :  { %v1970_v22 = vpop.eup %1969  ;;  %903 = vperm.xlu1 %1954, %v1968_v21   ;;  %v828_v21 = vmul.f32 %v2230_v43, %v751_v55 }
 0x3a7   :  { %898 = vperm.xlu0 %1953, %v1970_v22  }
 0x3aa   :  { %v1702_v23 = vpop.f32.mrb[26].mxu0 }
 0x3ab   :  { %1975 = vrsqrt.f32 %v1702_v23  ;;  %v703_v24 = vpop.f32.mrb[27].mxu0 }
 0x3ac   :  { %1977 = vrsqrt.f32 %v703_v24  ;;  %v830_v24 = vmul.f32 %v2249_v51, %v761_v8 }
 0x3ad   :  { %v1972_v31 = vpop.eup %1971 }
 0x3ae   :  { %v1974_v32 = vpop.eup %1973  ;;  %913 = vperm.xlu1 %1954, %v1972_v31   ;;  %v844_v31 = vadd.f32 %v829_v16, %v828_v21 }
 0x3af   :  { %908 = vperm.xlu0 %1953, %v1974_v32   ;;  %v766_v32 = vpop.permute.xlu1 %765 }
 0x3b2   :  { %v1705_v37 = vpop.f32.mrb[28].mxu0 }
 0x3b3   :  { %1979 = vrsqrt.f32 %v1705_v37  ;;  %v713_v38 = vpop.f32.mrb[29].mxu0  ;;  %v771_v37 = vpop.permute.xlu0 %770 }
 0x3b4   :  { %1981 = vrsqrt.f32 %v713_v38  ;;  %v845_v38 = vadd.f32 %v844_v31, %v830_v24  ;;  %v776_v43 = vpop.permute.xlu1 %775 }
 0x3b5   :  { %v1976_v46 = vpop.eup %1975  ;;  %v833_v51 = vmul.f32 %v2273_v60, %v776_v43 }
 0x3b6   :  { %v1978_v48 = vpop.eup %1977  ;;  %923 = vperm.xlu1 %1954, %v1976_v46   ;;  %v831_v46 = vmul.f32 %v2253_v52, %v766_v32 }
 0x3b7   :  { %918 = vperm.xlu0 %1953, %v1978_v48   ;;  %v832_v48 = vmul.f32 %v2269_v59, %v771_v37  ;;  %v781_v55 = vpop.permute.xlu0 %780 }
 0x3b8   :  { %v846_v44 = vadd.f32 %v845_v38, %v831_v46  ;;  %v834_v8 = vmul.f32 %v2289_v3, %v781_v55  ;;  %v786_v16 = vpop.permute.xlu1 %785 }
 0x3b9   :  { %v835_v52 = vmul.f32 %v2293_v4, %v786_v16 }
 0x3ba   :  { %v1708_v5 = vpop.f32.mrb[30].mxu0  ;;  %v847_v62 = vadd.f32 %v846_v44, %v832_v48 }
 0x3bb   :  { %1983 = vrsqrt.f32 %v1708_v5  ;;  %v723_v15 = vpop.f32.mrb[31].mxu0  ;;  %v791_v21 = vpop.permute.xlu0 %790 }
 0x3bc   :  { %1985 = vrsqrt.f32 %v723_v15  ;;  %v848_v15 = vadd.f32 %v847_v62, %v833_v51  ;;  %v836_v59 = vmul.f32 %v2309_v11, %v791_v21  ;;  %v796_v24 = vpop.permute.xlu1 %795 }
 0x3bd   :  { %v1980_v22 = vpop.eup %1979  ;;  %v837_v37 = vmul.f32 %v2313_v12, %v796_v24 }
 0x3be   :  { %v1982_v23 = vpop.eup %1981  ;;  %933 = vperm.xlu1 %1954, %v1980_v22   ;;  %v849_v22 = vadd.f32 %v848_v15, %v834_v8 }
 0x3bf   :  { %928 = vperm.xlu0 %1953, %v1982_v23   ;;  %v801_v31 = vpop.permute.xlu0 %800 }
 0x3c0   :  { %v850_v23 = vadd.f32 %v849_v22, %v835_v52  ;;  %v806_v60 = vpop.permute.xlu1 %805 }
 0x3c1   :  { %v839_v48 = vmul.f32 %v2333_v20, %v806_v60 }
 0x3c2   :  { %v851_v32 = vadd.f32 %v850_v23, %v836_v59 }
 0x3c3   :  { %v811_v46 = vpop.permute.xlu0 %810 }
 0x3c4   :  { %v852_v38 = vadd.f32 %v851_v32, %v837_v37  ;;  %v816_v4 = vpop.permute.xlu1 %815 }
 0x3c5   :  { %v1984_v5 = vpop.eup %1983  ;;  %v841_v55 = vmul.f32 %v2353_v28, %v816_v4 }
 0x3c6   :  { %v1986_v13 = vpop.eup %1985  ;;  %943 = vperm.xlu1 %1954, %v1984_v5   ;;  %v840_v5 = vmul.f32 %v2349_v27, %v811_v46 }
 0x3c7   :  { %938 = vperm.xlu0 %1953, %v1986_v13   ;;  %v838_v13 = vmul.f32 %v2329_v19, %v801_v31  ;;  %v821_v43 = vpop.permute.xlu0 %820 }
 0x3c8   :  { %v842_v62 = vmul.f32 %v2369_v35, %v821_v43  ;;  %v826_v12 = vpop.permute.xlu1 %825 }
 0x3c9   :  { %v853_v3 = vadd.f32 %v852_v38, %v838_v13  ;;  %v843_v19 = vmul.f32 %v2373_v36, %v826_v12 }
 0x3cb   :  { %v854_v44 = vadd.f32 %v853_v3, %v839_v48 }
 0x3cd   :  { %v855_v11 = vadd.f32 %v854_v44, %v840_v5 }
 0x3cf   :  { %v856_v51 = vadd.f32 %v855_v11, %v841_v55 }
 0x3d1   :  { %v857_v8 = vadd.f32 %v856_v51, %v842_v62 }
 0x3d3   :  { %v858_v15 = vadd.f32 %v857_v8, %v843_v19 }
 0x3d5   :  { %v859_v16 = vrot.slane %v858_v15, 4 }
 0x3d7   :  { %v860_v21 = vadd.f32 %v859_v16, %v858_v15 }
 0x3d9   :  { %v861_v22 = vrot.slane %v860_v21, 2 }
 0x3db   :  { %v862_v20 = vadd.f32 %v861_v22, %v860_v21 }
 0x3dd   :  { %v863_v52 = vrot.slane %v862_v20, 1 }
 0x3df   :  { %v864_v27 = vadd.f32 %v863_v52, %v862_v20 }
 0x3e1   :  { %1987 = vrsqrt.f32 %v864_v27 }
 0x3eb   :  { %v1988_v35 = vpop.eup %1987 }
 0x40d   :  { %v874_v59 = vpop.permute.xlu1 %873 }
 0x40e   :  { %v947_v23 = vmul.f32 %v874_v59, %v2241_v50  ;;  %v869_v24 = vpop.permute.xlu0 %868 }
 0x40f   :  { %v946_v28 = vmul.f32 %v869_v24, %v2238_v49 }
 0x410   :  { %v2451_v32 = vmul.f32 %v1988_v35, %v947_v23 }
 0x411   :  { %v962_v31 = vmul.f32 %v1988_v35, %v946_v28 }
 0x413   :  { %1741 = vmatprep.mubr.f32.mxu1 %v962_v31  ;;  %1797 = vmatprep.mubr.f32.mxu0 %v962_v31 }
 0x414   :  { %1742 = vmatmul.mubr.f32.vlgmr.msra.gmra.mrb[16].mxu1 %v2451_v32 }
 0x415   :  { %v884_v36 = vpop.permute.xlu1 %883 }
 0x416   :  { %v949_v37 = vmul.f32 %v884_v36, %v2261_v58  ;;  %v879_v13 = vpop.permute.xlu0 %878 }
 0x417   :  { %v948_v38 = vmul.f32 %v879_v13, %v2258_v57 }
 0x418   :  { %v2458_v50 = vmul.f32 %v1988_v35, %v949_v37 }
 0x419   :  { %v2456_v60 = vmul.f32 %v1988_v35, %v948_v38 }
 0x41b   :  { %1744 = vmatprep.mubr.f32.mxu1 %v2456_v60 }
 0x41c   :  { %1745 = vmatmul.mubr.f32.gmra.mrb[18].mxu1 %v2458_v50 }
 0x41d   :  { %v894_v49 = vpop.permute.xlu1 %893 }
 0x41e   :  { %v951_v46 = vmul.f32 %v894_v49, %v2281_v2  ;;  %v889_v3 = vpop.permute.xlu0 %888 }
 0x41f   :  { %v950_v48 = vmul.f32 %v889_v3, %v2278_v1 }
 0x420   :  { %v2466_v58 = vmul.f32 %v1988_v35, %v951_v46 }
 0x421   :  { %v2464_v5 = vmul.f32 %v1988_v35, %v950_v48 }
 0x423   :  { %1747 = vmatprep.mubr.f32.mxu1 %v2464_v5 }
 0x424   :  { %1748 = vmatmul.mubr.f32.gmra.mrb[20].mxu1 %v2466_v58 }
 0x425   :  { %v904_v57 = vpop.permute.xlu1 %903 }
 0x426   :  { %v953_v44 = vmul.f32 %v904_v57, %v2301_v10  ;;  %v899_v4 = vpop.permute.xlu0 %898 }
 0x427   :  { %v952_v43 = vmul.f32 %v899_v4, %v2298_v9 }
 0x428   :  { %v2474_v2 = vmul.f32 %v1988_v35, %v953_v44 }
 0x429   :  { %v2472_v11 = vmul.f32 %v1988_v35, %v952_v43 }
 0x42b   :  { %1750 = vmatprep.mubr.f32.mxu1 %v2472_v11 }
 0x42c   :  { %1751 = vmatmul.mubr.f32.gmra.mrb[22].mxu1 %v2474_v2 }
 0x42d   :  { %v914_v1 = vpop.permute.xlu1 %913 }
 0x42e   :  { %v955_v55 = vmul.f32 %v914_v1, %v2321_v18  ;;  %v909_v62 = vpop.permute.xlu0 %908 }
 0x42f   :  { %v954_v51 = vmul.f32 %v909_v62, %v2318_v17 }
 0x430   :  { %v2482_v10 = vmul.f32 %v1988_v35, %v955_v55 }
 0x431   :  { %v2480_v12 = vmul.f32 %v1988_v35, %v954_v51 }
 0x433   :  { %1753 = vmatprep.mubr.f32.mxu1 %v2480_v12 }
 0x434   :  { %1754 = vmatmul.mubr.f32.gmra.mrb[24].mxu1 %v2482_v10 }
 0x435   :  { %v924_v9 = vpop.permute.xlu1 %923 }
 0x436   :  { %v957_v8 = vmul.f32 %v924_v9, %v2341_v26  ;;  %v919_v19 = vpop.permute.xlu0 %918 }
 0x437   :  { %v956_v15 = vmul.f32 %v919_v19, %v2338_v25 }
 0x438   :  { %v2490_v18 = vmul.f32 %v1988_v35, %v957_v8 }
 0x439   :  { %v2488_v16 = vmul.f32 %v1988_v35, %v956_v15 }
 0x43b   :  { %1756 = vmatprep.mubr.f32.mxu1 %v2488_v16 }
 0x43c   :  { %1757 = vmatmul.mubr.f32.gmra.mrb[26].mxu1 %v2490_v18 }
 0x43d   :  { %v934_v17 = vpop.permute.xlu1 %933 }
 0x43e   :  { %v959_v21 = vmul.f32 %v934_v17, %v2361_v34  ;;  %v929_v22 = vpop.permute.xlu0 %928 }
 0x43f   :  { %v958_v20 = vmul.f32 %v929_v22, %v2358_v33 }
 0x440   :  { %v2498_v26 = vmul.f32 %v1988_v35, %v959_v21 }
 0x441   :  { %v2496_v52 = vmul.f32 %v1988_v35, %v958_v20 }
 0x443   :  { %1759 = vmatprep.mubr.f32.mxu1 %v2496_v52 }
 0x444   :  { %1760 = vmatmul.mubr.f32.gmra.mrb[28].mxu1 %v2498_v26 }
 0x445   :  { %v944_v25 = vpop.permute.xlu1 %943 }
 0x446   :  { %v961_v27 = vmul.f32 %v944_v25, %v2379_v41  ;;  %v939_v59 = vpop.permute.xlu0 %938 }
 0x447   :  { %v960_v23 = vmul.f32 %v939_v59, %v2376_v39 }
 0x448   :  { %v977_v28 = vmul.f32 %v1988_v35, %v961_v27 }
 0x449   :  { %v976_v24 = vmul.f32 %v1988_v35, %v960_v23 }
 0x44b   :  { %1762 = vmatprep.mubr.f32.mxu1 %v976_v24 }
 0x44c   :  { %1763 = vmatmul.mubr.f32.gmra.mrb[30].mxu1 %v977_v28 }
 0x44d   :  { %1818 = vmatprep.mubr.f32.mxu1 %v976_v24 }
 0x4e7   :  { %v2504_v33 = vpop.f32.mrb[16].mxu1 }
 0x4e8   :  { %v2506_v34 = vpop.f32.mrb[17].mxu1 }
 0x4e9   :  { %v1893_v31 = vpack.c.bf16 %v2504_v33, %v2506_v34 }
 0x4eb   :  { %1894 = vmatprep.subr.bf16.mxu0 %v1893_v31  ;;  %1925 = vmatprep.subr.bf16.mxu1 %v1893_v31 }
 0x4ec   :  { %1896 = vmatpush3.bf16.msra.mxu0 %v1893_v31  ;;  %1933 = vmatpush3.bf16.msra.mxu1 %v1893_v31 }
 0x4ef   :  { %v2510_v41 = vpop.f32.mrb[18].mxu1 }
 0x4f0   :  { %v2512_v36 = vpop.f32.mrb[19].mxu1 }
 0x4f1   :  { %v1897_v39 = vpack.c.bf16 %v2510_v41, %v2512_v36 }
 0x4f3   :  { %1898 = vmatprep.subr.bf16.mxu0 %v1897_v39  ;;  %1926 = vmatprep.subr.bf16.mxu1 %v1897_v39 }
 0x4f4   :  { %1900 = vmatpush3.bf16.msra.mxu0 %v1897_v39  ;;  %1934 = vmatpush3.bf16.msra.mxu1 %v1897_v39 }
 0x4f7   :  { %v2516_v35 = vpop.f32.mrb[20].mxu1 }
 0x4f8   :  { %v2518_v37 = vpop.f32.mrb[21].mxu1 }
 0x4f9   :  { %v1901_v13 = vpack.c.bf16 %v2516_v35, %v2518_v37 }
 0x4fb   :  { %1902 = vmatprep.subr.bf16.mxu0 %v1901_v13  ;;  %1927 = vmatprep.subr.bf16.mxu1 %v1901_v13 }
 0x4fc   :  { %1904 = vmatpush3.bf16.msra.mxu0 %v1901_v13  ;;  %1935 = vmatpush3.bf16.msra.mxu1 %v1901_v13 }
 0x4ff   :  { %v2522_v38 = vpop.f32.mrb[22].mxu1 }
 0x500   :  { %v2524_v49 = vpop.f32.mrb[23].mxu1 }
 0x501   :  { %v1905_v46 = vpack.c.bf16 %v2522_v38, %v2524_v49 }
 0x503   :  { %1906 = vmatprep.subr.bf16.mxu0 %v1905_v46  ;;  %1928 = vmatprep.subr.bf16.mxu1 %v1905_v46 }
 0x504   :  { %1908 = vmatpush3.bf16.msra.mxu0 %v1905_v46  ;;  %1936 = vmatpush3.bf16.msra.mxu1 %v1905_v46 }
 0x507   :  { %v2528_v3 = vpop.f32.mrb[24].mxu1 }
 0x508   :  { %v2530_v48 = vpop.f32.mrb[25].mxu1  ;;  %v1148_v39 = vadd.f32 %v2528_v3, %v2411_v0 }
 0x509   :  { %v1909_v57 = vpack.c.bf16 %v2528_v3, %v2530_v48 }
 0x50b   :  { %1910 = vmatprep.subr.bf16.mxu0 %v1909_v57  ;;  %1929 = vmatprep.subr.bf16.mxu1 %v1909_v57 }
 0x50c   :  { %1912 = vmatpush3.bf16.msra.mxu0 %v1909_v57  ;;  %1937 = vmatpush3.bf16.msra.mxu1 %v1909_v57 }
 0x50f   :  { %v2534_v44 = vpop.f32.mrb[26].mxu1 }
 0x510   :  { %v2536_v4 = vpop.f32.mrb[27].mxu1 }
 0x511   :  { %v1913_v43 = vpack.c.bf16 %v2534_v44, %v2536_v4 }
 0x513   :  { %1914 = vmatprep.subr.bf16.mxu0 %v1913_v43  ;;  %1930 = vmatprep.subr.bf16.mxu1 %v1913_v43 }
 0x514   :  { %1916 = vmatpush3.bf16.msra.mxu0 %v1913_v43  ;;  %1938 = vmatpush3.bf16.msra.mxu1 %v1913_v43  ;;  %v1149_v43 = vadd.f32 %v2536_v4, %v2415_v6 }
 0x517   :  { %v2540_v1 = vpop.f32.mrb[28].mxu1 }
 0x518   :  { %v2542_v55 = vpop.f32.mrb[29].mxu1 }
 0x519   :  { %v1917_v62 = vpack.c.bf16 %v2540_v1, %v2542_v55 }
 0x51b   :  { %1918 = vmatprep.subr.bf16.mxu0 %v1917_v62  ;;  %1931 = vmatprep.subr.bf16.mxu1 %v1917_v62 }
 0x51c   :  { %1920 = vmatpush3.bf16.msra.mxu0 %v1917_v62  ;;  %1939 = vmatpush3.bf16.msra.mxu1 %v1917_v62 }
 0x51f   :  { %v1764_v51 = vpop.f32.mrb[30].mxu1 }
 0x520   :  { %v1130_v9 = vpop.f32.mrb[31].mxu1 }
 0x521   :  { %v1921_v8 = vpack.c.bf16 %v1764_v51, %v1130_v9 }
 0x523   :  { %1922 = vmatprep.subr.bf16.mxu0 %v1921_v8  ;;  %1932 = vmatprep.subr.bf16.mxu1 %v1921_v8 }
 0x524   :  { %1924 = vmatpush3.bf16.msra.mxu0 %v1921_v8  ;;  %1940 = vmatpush3.bf16.msra.mxu1 %v1921_v8  ;;  %v2611_v8 = vld [vmem:[#allocation15_spill] sm:$0xff] }
 0x527   :  { %1798 = vmatmul.mubr.f32.vlgmr.msra.gmra.mrb[32].mxu0 %v2451_v32  ;;  %1819 = vmatmul.mubr.f32.vlgmr.msra.gmra.mrb[32].mxu1 %v977_v28  ;;  %v1140_v32 = vadd.f32 %v2504_v33, %v2387_v42  ;;  %v1146_v28 = vadd.f32 %v2522_v38, %v2405_v61 }
 0x528   :  { %1800 = vmatprep.mubr.f32.mxu0 %v2456_v60  ;;  %v1154_v60 = vadd.f32 %v1764_v51, %v2429_v30  ;;  %v1141_v30 = vadd.f32 %v2512_v36, %v2389_v45 }
 0x52b   :  { %1801 = vmatmul.mubr.f32.gmra.mrb[34].mxu0 %v2458_v50  ;;  %v1139_v50 = vadd.f32 %v2506_v34, %v2385_v40  ;;  %v1145_v34 = vadd.f32 %v2524_v49, %v2403_v56  ;;  %v1150_v49 = vadd.f32 %v2534_v44, %v2417_v7 }
 0x52c   :  { %1803 = vmatprep.mubr.f32.mxu0 %v2464_v5  ;;  %v1153_v5 = vadd.f32 %v1130_v9, %v2427_v29 }
 0x52f   :  { %1804 = vmatmul.mubr.f32.gmra.mrb[36].mxu0 %v2466_v58 }
 0x530   :  { %1806 = vmatprep.mubr.f32.mxu0 %v2472_v11 }
 0x533   :  { %1807 = vmatmul.mubr.f32.gmra.mrb[38].mxu0 %v2474_v2 }
 0x534   :  { %1809 = vmatprep.mubr.f32.mxu0 %v2480_v12 }
 0x537   :  { %1810 = vmatmul.mubr.f32.gmra.mrb[40].mxu0 %v2482_v10 }
 0x538   :  { %1812 = vmatprep.mubr.f32.mxu0 %v2488_v16 }
 0x53b   :  { %1813 = vmatmul.mubr.f32.gmra.mrb[42].mxu0 %v2490_v18  ;;  %v1142_v18 = vadd.f32 %v2510_v41, %v2393_v47  ;;  %v1143_v47 = vadd.f32 %v2518_v37, %v2397_v53  ;;  %v1147_v37 = vadd.f32 %v2530_v48, %v2409_v63  ;;  %v1152_v48 = vadd.f32 %v2540_v1, %v2423_v14 }
 0x53c   :  { %1815 = vmatprep.mubr.f32.mxu0 %v2496_v52 }
 0x53f   :  { %1816 = vmatmul.mubr.f32.gmra.mrb[44].mxu0 %v2498_v26  ;;  %v1144_v26 = vadd.f32 %v2516_v35, %v2399_v54 }
 0x5fa   :  { %v1799_v58 = vpop.f32.mrb[32].mxu0  ;;  %v1820_v11 = vpop.f32.mrb[32].mxu1 }
 0x5fb   :  { %v1301_v2 = vadd.f32 %v1799_v58, %v1140_v32  ;;  %v1315_v12 = vadd.f32 %v1820_v11, %v1154_v60  ;;  %v1221_v10 = vpop.f32.mrb[33].mxu0  ;;  %v1291_v19 = vpop.f32.mrb[33].mxu1  ;;  %v1151_v32 = vadd.f32 %v2542_v55, %v2611_v8 }
 0x5fc   :  { %v1300_v15 = vadd.f32 %v1221_v10, %v1139_v50  ;;  %v1314_v16 = vadd.f32 %v1291_v19, %v1153_v5 }
 0x5fd   :  { %v1317_v17 = vmul.f32 0.33333334, %v1301_v2  ;;  %v1331_v42 = vmul.f32 0.33333334, %v1315_v12 }
 0x5fe   :  { %v1316_v21 = vmul.f32 0.33333334, %v1300_v15  ;;  %v1330_v40 = vmul.f32 0.33333334, %v1314_v16  ;;  %v1802_v22 = vpop.f32.mrb[34].mxu0 }
 0x5ff   :  { %1333 = vst [vmem:[#allocation10 + $0x8] sm:$0xff] %v1317_v17  ;;  %1347 = vst [vmem:[#allocation10 + $0x78] sm:$0xff] %v1331_v42  ;;  %v1303_v29 = vadd.f32 %v1802_v22, %v1142_v18  ;;  %v1231_v20 = vpop.f32.mrb[35].mxu0 }
 0x600   :  { %1332 = vst [vmem:[#allocation10] sm:$0xff] %v1316_v21  ;;  %1346 = vst [vmem:[#allocation10 + $0x70] sm:$0xff] %v1330_v40  ;;  %v1302_v52 = vadd.f32 %v1231_v20, %v1141_v30 }
 0x601   :  { %v1319_v25 = vmul.f32 0.33333334, %v1303_v29 }
 0x602   :  { %v1318_v27 = vmul.f32 0.33333334, %v1302_v52  ;;  %v1805_v59 = vpop.f32.mrb[36].mxu0 }
 0x603   :  { %1335 = vst [vmem:[#allocation10 + $0x18] sm:$0xff] %v1319_v25  ;;  %v1305_v45 = vadd.f32 %v1805_v59, %v1144_v26  ;;  %v1241_v23 = vpop.f32.mrb[37].mxu0 }
 0x604   :  { %1334 = vst [vmem:[#allocation10 + $0x10] sm:$0xff] %v1318_v27  ;;  %v1304_v24 = vadd.f32 %v1241_v23, %v1143_v47 }
 0x605   :  { %v1321_v33 = vmul.f32 0.33333334, %v1305_v45 }
 0x606   :  { %v1320_v31 = vmul.f32 0.33333334, %v1304_v24  ;;  %v1808_v54 = vpop.f32.mrb[38].mxu0 }
 0x607   :  { %1337 = vst [vmem:[#allocation10 + $0x28] sm:$0xff] %v1321_v33  ;;  %v1307_v41 = vadd.f32 %v1808_v54, %v1146_v28  ;;  %v1251_v36 = vpop.f32.mrb[39].mxu0 }
 0x608   :  { %1336 = vst [vmem:[#allocation10 + $0x20] sm:$0xff] %v1320_v31  ;;  %v1306_v53 = vadd.f32 %v1251_v36, %v1145_v34 }
 0x609   :  { %v1323_v35 = vmul.f32 0.33333334, %v1307_v41 }
 0x60a   :  { %v1322_v13 = vmul.f32 0.33333334, %v1306_v53  ;;  %v1811_v61 = vpop.f32.mrb[40].mxu0 }
 0x60b   :  { %1339 = vst [vmem:[#allocation10 + $0x38] sm:$0xff] %v1323_v35  ;;  %v1309_v38 = vadd.f32 %v1811_v61, %v1148_v39  ;;  %v1261_v46 = vpop.f32.mrb[41].mxu0 }
 0x60c   :  { %1338 = vst [vmem:[#allocation10 + $0x30] sm:$0xff] %v1322_v13  ;;  %v1308_v56 = vadd.f32 %v1261_v46, %v1147_v37 }
 0x60d   :  { %v1325_v57 = vmul.f32 0.33333334, %v1309_v38 }
 0x60e   :  { %v1324_v62 = vmul.f32 0.33333334, %v1308_v56  ;;  %v1814_v0 = vpop.f32.mrb[42].mxu0 }
 0x60f   :  { %1341 = vst [vmem:[#allocation10 + $0x48] sm:$0xff] %v1325_v57  ;;  %v1311_v3 = vadd.f32 %v1814_v0, %v1150_v49  ;;  %v1271_v51 = vpop.f32.mrb[43].mxu0 }
 0x610   :  { %1340 = vst [vmem:[#allocation10 + $0x40] sm:$0xff] %v1324_v62  ;;  %v1310_v63 = vadd.f32 %v1271_v51, %v1149_v43 }
 0x611   :  { %v1327_v9 = vmul.f32 0.33333334, %v1311_v3 }
 0x612   :  { %v1326_v60 = vmul.f32 0.33333334, %v1310_v63  ;;  %v1817_v7 = vpop.f32.mrb[44].mxu0 }
 0x613   :  { %1343 = vst [vmem:[#allocation10 + $0x58] sm:$0xff] %v1327_v9  ;;  %v1313_v44 = vadd.f32 %v1817_v7, %v1152_v48  ;;  %v1281_v50 = vpop.f32.mrb[45].mxu0 }
 0x614   :  { %1342 = vst [vmem:[#allocation10 + $0x50] sm:$0xff] %v1326_v60  ;;  %v1312_v6 = vadd.f32 %v1281_v50, %v1151_v32 }
 0x615   :  { %v1329_v4 = vmul.f32 0.33333334, %v1313_v44 }
 0x616   :  { %v1328_v5 = vmul.f32 0.33333334, %v1312_v6 }
 0x617   :  { %1345 = vst [vmem:[#allocation10 + $0x68] sm:$0xff] %v1329_v4 }
 0x618   :  { %1344 = vst [vmem:[#allocation10 + $0x60] sm:$0xff] %v1328_v5 }
 0x619   :  { %2088 = shalt.err (!%p2085_p8)
}
 0x61a   :  { %s2089_s15 = scalar_lea.hbm %s2608_s4, 2048 }
 0x61b   :  { %p2090_p9 = scmp.ne.s32.totalorder %s2608_s4, %s2089_s15  ;;  %p2093_p10 = scmp.lt.u32.totalorder %s2089_s15, %s2608_s4 }
 0x61d   :  { %p2095_p11 = pnand %p2093_p10, %p2090_p9 }
 0x61f   :  { %2098 = shalt.err (!%p2095_p11)
}
 0x620   :  { %1359 = dma.vmem_to_hbm [thread:$0]  %s1354_s12, 2048, %s2608_s4, [#allocation4], %s2112_s0, %s2112_s0, %s2113_s18  }
 0x621   :  { %2105 = dma.done.wait [#allocation4], 2048  }
 0x622   :  { %2106 = vsyncadd [#allocation4], 4294965248 }
 0x623   :  { %1363 = vsyncpa [#allocation3], 1 }
 0x624   :  { %1364 = vsyncpa [#allocation6], 1 }
 0x625   :  { %1365 = vsyncpa [#allocation9], 1 }
 0x626   :  { %1366 = vsyncpa [#allocation4], 1 }

</bundles_post_ra>
